<compile_context>
chip_gen: v7x
topology: tpu7x:2x2x1
jax: 0.10.0
libtpu: 0.0.40
codegen_flags: <defaults>
</compile_context>

<pallas_src>
import numpy as np

import jax
import jax.numpy as jnp
from jax.experimental import pallas as pl
from jax.experimental.pallas import tpu as pltpu

_LANES = 128  # lane-dense output width; lanes 0..25 carry the result


def _gather_sum_kernel(idx_ref, w_hbm, out_ref, row_buf, sem):
    # idx_ref : [N]          int32, SMEM  (embedding indices)
    # w_hbm   : [E, 128]     f32,   HBM   (folded + lane-padded table, not DMAed wholesale)
    # out_ref : [1, 128]     f32,   VMEM  (lane-dense accumulator / output)
    # row_buf : [2, 1, 128]  f32,   VMEM  (double-buffered row landing zone)
    # sem     : DMA semaphores (2,)
    n_idx = idx_ref.shape[0]

    def fetch(n, slot):
        # Gather one table row W_folded[idx[n], :] from HBM into the given slot.
        pltpu.make_async_copy(
            w_hbm.at[pl.ds(idx_ref[n], 1), :],
            row_buf.at[slot],
            sem.at[slot],
        ).start()

    out_ref[...] = jnp.zeros_like(out_ref)
    fetch(0, 0)  # prime the pipeline

    @pl.loop(0, n_idx)
    def _(n):
        slot = n & 1

        # Wait for the row we are about to consume.
        pltpu.make_async_copy(
            w_hbm.at[pl.ds(0, 1), :], row_buf.at[slot], sem.at[slot]
        ).wait()

        # Prefetch the next row into the other slot (overlaps with the add).
        @pl.when(n + 1 < n_idx)
        def _():
            fetch(n + 1, 1 - slot)

        out_ref[...] += row_buf[slot]


def fold_weights(weights):
    """Fold the 10 EmbeddingBag tables + cat/dim-1-sum postprocessing into one
    [E, 128] lane-padded table.  Compute ONCE per weight set (hoisted out of
    the per-call path, per review) -- weights are static at inference."""
    num_tables, E, D = weights.shape
    assert num_tables == 10 and D == 3
    # P maps the 30 concatenated columns to the 26 final outputs:
    #   tables 0..4 -> cols 0..14, table 5 -> col 15 (summed),
    #   table 6 -> col 16 (summed), tables 7..9 -> cols 17..25.
    P = np.zeros((num_tables, D, 26), dtype=np.float32)
    out_col = 0
    for t in range(num_tables):
        if t in (5, 6):
            P[t, :, out_col] = 1.0
            out_col += 1
        else:
            for d in range(D):
                P[t, d, out_col] = 1.0
                out_col += 1
    assert out_col == 26
    w_folded = jnp.einsum("ted,tdc->ec", weights, jnp.asarray(P))  # [E, 26]
    return jnp.pad(w_folded, ((0, 0), (0, _LANES - 26)))           # [E, 128]


def embedding_bag_sum_nodes_folded(eb_input, w_pad):
    """Forward pass given the pre-folded table (preferred repeated-call path)."""
    n_idx = eb_input.shape[0]
    assert n_idx >= 1
    idx = eb_input.astype(jnp.int32)

    cost = pl.CostEstimate(
        flops=n_idx * _LANES,  # N lane-wide row accumulations
        transcendentals=0,
        bytes_accessed=n_idx * (_LANES * 4 + 4) + _LANES * 4,
    )

    out = pl.pallas_call(
        _gather_sum_kernel,
        out_shape=jax.ShapeDtypeStruct((1, _LANES), jnp.float32),
        in_specs=[
            pl.BlockSpec(memory_space=pltpu.MemorySpace.SMEM),  # indices -> SMEM
            pl.BlockSpec(memory_space=pl.ANY),                  # table stays in HBM
        ],
        out_specs=pl.BlockSpec(memory_space=pltpu.MemorySpace.VMEM),
        scratch_shapes=[
            pltpu.VMEM((2, 1, _LANES), jnp.float32),            # double buffer
            pltpu.SemaphoreType.DMA((2,)),
        ],
        cost_estimate=cost,
    )(idx, w_pad)
    return out[0, :26]


def embedding_bag_sum_nodes(eb_input, eb_offset, weights):
    """Interface-parity wrapper. eb_offset is accepted but algebraically
    eliminated (see module docstring). For repeated calls, precompute
    fold_weights(weights) once and call embedding_bag_sum_nodes_folded."""
    del eb_offset
    return embedding_bag_sum_nodes_folded(eb_input, fold_weights(weights))


def _reference(eb_input, eb_offset, weights):
    """Pure-JAX reference mirroring the PyTorch forward (uses offsets)."""
    N = eb_input.shape[0]
    B = eb_offset.shape[0]
    off_next = jnp.concatenate(
        [eb_offset[1:].astype(jnp.int32), jnp.array([N], dtype=jnp.int32)]
    )
    pos = jnp.arange(N)
    outs = []
    for t in range(10):
        g = weights[t][eb_input]  # [N, 3]
        bags = []
        for b in range(B):
            mask = (pos >= eb_offset[b]) & (pos < off_next[b])
            bags.append(jnp.sum(g * mask[:, None].astype(g.dtype), axis=0))
        outs.append(jnp.stack(bags))  # [B, 3]
    outs[5] = jnp.sum(outs[5], axis=1, keepdims=True)
    outs[6] = jnp.sum(outs[6], axis=1, keepdims=True)
    return jnp.sum(jnp.concatenate(outs, axis=1), axis=0)  # [26]


if __name__ == "__main__":
    key = jax.random.PRNGKey(0)
    k_w, k_idx = jax.random.split(key)

    num_embeddings = 50   # vocab size
    N = 16                # number of indices
    B = 5                 # number of bags

    # EmbeddingBag weights default to N(0, 1) in PyTorch.
    weights = jax.random.normal(k_w, (10, num_embeddings, 3), dtype=jnp.float32)
    eb_input = jax.random.randint(k_idx, (N,), 0, num_embeddings, dtype=jnp.int32)
    eb_offset = jnp.array([0, 2, 5, 9, 12], dtype=jnp.int32)

    # Hoisted fold: computed once and reused across calls (review item).
    w_pad = jax.block_until_ready(fold_weights(weights))

    run = jax.jit(embedding_bag_sum_nodes_folded)
    out = jax.block_until_ready(run(eb_input, w_pad))

    ref = _reference(eb_input, eb_offset, weights)
    assert out.shape == (26,), out.shape
    assert jnp.allclose(out, ref, rtol=1e-5, atol=1e-5), (out, ref)

    print("KERNEL_OK")
</pallas_src>

<mosaic_0001>
module attributes {stable_mosaic.version = 11 : i64} {
  func.func @_gather_sum_kernel(%arg0: memref<16xi32, #tpu.memory_space<smem>>, %arg1: memref<50x128xf32, #tpu.memory_space<any>>, %arg2: memref<1x128xf32, #tpu.memory_space<vmem>>, %arg3: memref<2x1x128xf32, #tpu.memory_space<vmem>>, %arg4: memref<2x!tpu.dma_semaphore, #tpu.memory_space<semaphore_mem>>) attributes {dimension_semantics = [], scalar_prefetch = 0 : i64, scratch_operands = 2 : i64, tpu.core_type = #tpu.core_type<tc>} {
    %cst = arith.constant 0.000000e+00 : f32
    %0 = vector.broadcast %cst : f32 to vector<1x128xf32>
    %c0 = arith.constant 0 : index
    %c0_0 = arith.constant 0 : index
    %1 = vector.load %arg2[%c0, %c0_0] : memref<1x128xf32, #tpu.memory_space<vmem>>, vector<1x128xf32>
    tpu.vector_store %arg2[%c0, %c0_0], %0 {strides = array<i32>} : memref<1x128xf32, #tpu.memory_space<vmem>>, vector<1x128xf32>,
    %c0_1 = arith.constant 0 : index
    %2 = memref.load %arg0[%c0_1] : memref<16xi32, #tpu.memory_space<smem>>
    %c0_i32 = arith.constant 0 : i32
    %c0_i32_2 = arith.constant 0 : i32
    %c0_i32_3 = arith.constant 0 : i32
    %3 = tpu.memref_slice %arg1[%2, %c0_i32_3] : memref<50x128xf32, #tpu.memory_space<any>> -> memref<1x128xf32, #tpu.memory_space<any>>
    %c0_i32_4 = arith.constant 0 : i32
    %c0_i32_5 = arith.constant 0 : i32
    %4 = tpu.memref_slice %arg3[%c0_i32, %c0_i32_4, %c0_i32_5] : memref<2x1x128xf32, #tpu.memory_space<vmem>> -> memref<1x1x128xf32, #tpu.memory_space<vmem>>
    %5 = tpu.memref_squeeze %4 : memref<1x1x128xf32, #tpu.memory_space<vmem>> -> memref<1x128xf32, #tpu.memory_space<vmem>>
    %6 = tpu.memref_slice %arg4[%c0_i32_2] : memref<2x!tpu.dma_semaphore, #tpu.memory_space<semaphore_mem>> -> memref<1x!tpu.dma_semaphore, #tpu.memory_space<semaphore_mem>>
    %7 = tpu.memref_squeeze %6 : memref<1x!tpu.dma_semaphore, #tpu.memory_space<semaphore_mem>> -> memref<!tpu.dma_semaphore, #tpu.memory_space<semaphore_mem>>
    tpu.enqueue_dma source(%3 : memref<1x128xf32, #tpu.memory_space<any>>) target(%5 : memref<1x128xf32, #tpu.memory_space<vmem>>) target_semaphore(%7 : memref<!tpu.dma_semaphore, #tpu.memory_space<semaphore_mem>>)
    %c0_i32_6 = arith.constant 0 : i32
    %c16_i32 = arith.constant 16 : i32
    %8 = arith.addi %c0_i32_6, %c16_i32 : i32
    %c1_i32 = arith.constant 1 : i32
    scf.for %arg5 = %c0_i32_6 to %8 step %c1_i32  : i32 {
      %c1_i32_8 = arith.constant 1 : i32
      %9 = arith.muli %arg5, %c1_i32_8 : i32
      %c0_i32_9 = arith.constant 0 : i32
      %10 = arith.addi %c0_i32_9, %9 : i32
      %c1_i32_10 = arith.constant 1 : i32
      %11 = arith.andi %10, %c1_i32_10 : i32
      %c0_i32_11 = arith.constant 0 : i32
      %c0_i32_12 = arith.constant 0 : i32
      %12 = tpu.memref_slice %arg1[%c0_i32_11, %c0_i32_12] : memref<50x128xf32, #tpu.memory_space<any>> -> memref<1x128xf32, #tpu.memory_space<any>>
      %c0_i32_13 = arith.constant 0 : i32
      %c0_i32_14 = arith.constant 0 : i32
      %13 = tpu.memref_slice %arg3[%11, %c0_i32_13, %c0_i32_14] : memref<2x1x128xf32, #tpu.memory_space<vmem>> -> memref<1x1x128xf32, #tpu.memory_space<vmem>>
      %14 = tpu.memref_squeeze %13 : memref<1x1x128xf32, #tpu.memory_space<vmem>> -> memref<1x128xf32, #tpu.memory_space<vmem>>
      %15 = tpu.memref_slice %arg4[%11] : memref<2x!tpu.dma_semaphore, #tpu.memory_space<semaphore_mem>> -> memref<1x!tpu.dma_semaphore, #tpu.memory_space<semaphore_mem>>
      %16 = tpu.memref_squeeze %15 : memref<1x!tpu.dma_semaphore, #tpu.memory_space<semaphore_mem>> -> memref<!tpu.dma_semaphore, #tpu.memory_space<semaphore_mem>>
      tpu.wait_dma2 semaphore(%16 : memref<!tpu.dma_semaphore, #tpu.memory_space<semaphore_mem>>) src(%12 : memref<1x128xf32, #tpu.memory_space<any>>) dst(%14 : memref<1x128xf32, #tpu.memory_space<vmem>>)
      %c1_i32_15 = arith.constant 1 : i32
      %17 = arith.addi %10, %c1_i32_15 : i32
      %c16_i32_16 = arith.constant 16 : i32
      %18 = arith.cmpi slt, %17, %c16_i32_16 : i32
      %19 = arith.extui %18 : i1 to i32
      %c0_i32_17 = arith.constant 0 : i32
      %20 = arith.cmpi ne, %19, %c0_i32_17 : i32
      scf.if %20 {
        %c1_i32_24 = arith.constant 1 : i32
        %27 = arith.addi %10, %c1_i32_24 : i32
        %c1_i32_25 = arith.constant 1 : i32
        %28 = arith.subi %c1_i32_25, %11 : i32
        %29 = arith.index_cast %27 : i32 to index
        %30 = memref.load %arg0[%29] : memref<16xi32, #tpu.memory_space<smem>>
        %c0_i32_26 = arith.constant 0 : i32
        %31 = tpu.memref_slice %arg1[%30, %c0_i32_26] : memref<50x128xf32, #tpu.memory_space<any>> -> memref<1x128xf32, #tpu.memory_space<any>>
        %c0_i32_27 = arith.constant 0 : i32
        %c0_i32_28 = arith.constant 0 : i32
        %32 = tpu.memref_slice %arg3[%28, %c0_i32_27, %c0_i32_28] : memref<2x1x128xf32, #tpu.memory_space<vmem>> -> memref<1x1x128xf32, #tpu.memory_space<vmem>>
        %33 = tpu.memref_squeeze %32 : memref<1x1x128xf32, #tpu.memory_space<vmem>> -> memref<1x128xf32, #tpu.memory_space<vmem>>
        %34 = tpu.memref_slice %arg4[%28] : memref<2x!tpu.dma_semaphore, #tpu.memory_space<semaphore_mem>> -> memref<1x!tpu.dma_semaphore, #tpu.memory_space<semaphore_mem>>
        %35 = tpu.memref_squeeze %34 : memref<1x!tpu.dma_semaphore, #tpu.memory_space<semaphore_mem>> -> memref<!tpu.dma_semaphore, #tpu.memory_space<semaphore_mem>>
        tpu.enqueue_dma source(%31 : memref<1x128xf32, #tpu.memory_space<any>>) target(%33 : memref<1x128xf32, #tpu.memory_space<vmem>>) target_semaphore(%35 : memref<!tpu.dma_semaphore, #tpu.memory_space<semaphore_mem>>)
      } else {
      }
      %c0_18 = arith.constant 0 : index
      %c0_19 = arith.constant 0 : index
      %21 = vector.load %arg2[%c0_18, %c0_19] : memref<1x128xf32, #tpu.memory_space<vmem>>, vector<1x128xf32>
      %22 = arith.index_cast %11 : i32 to index
      %c0_20 = arith.constant 0 : index
      %c0_21 = arith.constant 0 : index
      %23 = vector.load %arg3[%22, %c0_20, %c0_21] : memref<2x1x128xf32, #tpu.memory_space<vmem>>, vector<1x1x128xf32>
      %24 = vector.shape_cast %23 : vector<1x1x128xf32> to vector<1x128xf32>
      %25 = arith.addf %21, %24 : vector<1x128xf32>
      %c0_22 = arith.constant 0 : index
      %c0_23 = arith.constant 0 : index
      %26 = vector.load %arg2[%c0_22, %c0_23] : memref<1x128xf32, #tpu.memory_space<vmem>>, vector<1x128xf32>
      tpu.vector_store %arg2[%c0_22, %c0_23], %25 {strides = array<i32>} : memref<1x128xf32, #tpu.memory_space<vmem>>, vector<1x128xf32>,
    }
    %c16_i32_7 = arith.constant 16 : i32
    return
  }
}

</mosaic_0001>

<bundles_post_ra>
// kernel: embedding_bag_sum_nodes_folded.1
= control target key start
LH: loop header
LB: loop body
LE: loop exit
PB: predicated region body
PF: predicated region fallthrough
CT: control target
= control target key end

     0   :  { %7 = vsyncpa [#allocation5], 0  ;;  %s304_s0 = inlined_call_operand.hbm [shape: s32[16], index: 0, kind: input, shape index: {}]   ;;  %s305_s1 = inlined_call_operand.hbm [shape: f32[50,128], index: 1, kind: input, shape index: {}]   ;;  %s306_s2 = inlined_call_operand.vmem [shape: f32[1,128], index: 2, kind: output, shape index: {}]  }
   0x1   :  { %s125_s11 = scalar_lea.hbm %s304_s0, 16 }
   0x2   :  { %p126_p0 = scmp.ne.s32.totalorder %s304_s0, %s125_s11  ;;  %p129_p1 = scmp.lt.u32.totalorder %s125_s11, %s304_s0 }
   0x4   :  { %p131_p2 = pnand %p129_p1, %p126_p0 }
   0x6   :  { %134 = shalt.err (!%p131_p2)
}
   0x7   :  { %s199_s16 = smov [#allocation4]  }
   0x8   :  { %15 = dma.hbm_to_smem %s304_s0, 16, %s199_s16, [#allocation5]  }
   0x9   :  { %191 = dma.done.wait [#allocation5], 16  }
   0xa   :  { %192 = vsyncadd [#allocation5], 4294967280 }
   0xb   :  { %19 = sfence }
   0xc   :  { %s21_s19 = sld [smem:[#allocation4]]  ;;  %v200_v0 = vmov 0.0   ;;  %s201_s22 = smov [#allocation2]  }
   0xd   :  { %20 = vst [vmem:[%s306_s2] sm:$0x1] %v200_v0  ;;  %s31_s23 = sshll.u32 %s201_s22, 4  ;;  %s137_s30 = scalar_lea.hbm %s305_s1, 896  ;;  %s232_s23 = int_to_ptr.vmem [resolvable:$true] %s31_s23 }
  0x12   :  { %s104_s24 = sshll.u32 %s21_s19, 4 }
  0x13   :  { %s23_s27 = scalar_lea.hbm %s305_s1, %s104_s24 }
  0x14   :  { %s135_s28 = scalar_lea.hbm %s23_s27, 16  ;;  %p138_p4 = scmp.lt.u32.totalorder %s23_s27, %s305_s1 }
  0x15   :  { %p136_p3 = scmp.ne.s32.totalorder %s23_s27, %s135_s28  ;;  %p139_p5 = scmp.lt.u32.totalorder %s137_s30, %s135_s28 }
  0x16   :  { %p141_p7 = scmp.lt.u32.totalorder %s135_s28, %s23_s27 }
  0x17   :  { %p140_p6 = por %p139_p5, %p138_p4 }
  0x19   :  { %p142_p8 = por %p141_p7, %p140_p6 }
  0x1b   :  { %p143_p9 = pnand %p142_p8, %p136_p3 }
  0x1d   :  { %146 = shalt.err (!%p143_p9)  }
  0x1e   :  { %s147_s7 = scalar_lea.vmem %s232_s23, 16  ;;  %s151_s8 = scalar_lea.vmem %s232_s23, 32 }
  0x1f   :  { %p148_p10 = scmp.ne.s32.totalorder %s232_s23, %s147_s7  ;;  %p152_p11 = scmp.lt.s32.totalorder %s232_s23, %s232_s23 }
  0x20   :  { %p153_p12 = scmp.lt.s32.totalorder %s151_s8, %s147_s7 }
  0x22   :  { %p154_p13 = por %p153_p12, %p152_p11 }
  0x24   :  { %p155_p0 = pnand %p154_p13, %p148_p10 }
  0x26   :  { %158 = shalt.err (!%p155_p0)  }
  0x27   :  { %34 = dma.hbm_to_vmem [thread:$0]  %s23_s27, 16, %s232_s23, [#allocation3] }
  0x28   :  { %s255_s9 = smov 0  }
  0x29 LB: > { %s258_s10 = sand.u32 1, %s197_s9  ;;  %s197_s9 = sphi %s255_s9, %s262_s9  }
  0x2a   : > { %s42_s11 = scalar_lea.vmem [#allocation2], %s258_s10  ;;  %s43_s12 = scalar_lea.sflag [#allocation3], %s258_s10 }
  0x2b   : > { %193 = dma.done.wait %s43_s12, 16 }
  0x2c   : > { %194 = vsyncadd %s43_s12, 4294967280  ;;  %s262_s9 = sadd.s32 1, %s197_s9   ;;  %s52_s13 = ssub.s32 1, %s258_s10 }
  0x2d   : > { %p113_p2 = scmp.lt.s32.totalorder %s262_s9, 16  ;;  %s56_s17 = scalar_lea.vmem [#allocation2], %s52_s13 }
  0x2e   : > { %s65_s18 = sshll.u32 %s56_s17, 4  ;;  %s57_s24 = scalar_lea.sflag [#allocation3], %s52_s13  ;;  %s66_s18 = int_to_ptr.vmem [resolvable:$true] %s65_s18 }
  0x2f   : > { %s110_s14 = scalar_select %p113_p2, [#allocation4], [#allocation12] }
  0x30   : > { %s111_s15 = scalar_select %p113_p2, %s262_s9, 0 }
  0x32   : > { %s53_s16 = sld [smem:[%s110_s14 + %s111_s15]] }
  0x38   : > { %s106_s19 = sshll.u32 %s53_s16, 4 }
  0x39   : > { %s55_s22 = scalar_lea.hbm %s305_s1, %s106_s19 }
  0x3a   : > { %s159_s25 = scalar_lea.hbm %s55_s22, 16  ;;  %p164_p6 = scmp.lt.u32.totalorder %s55_s22, %s305_s1 }
  0x3b   : > { %p160_p3 = scmp.ne.s32.totalorder %s55_s22, %s159_s25  ;;  %p165_p7 = scmp.lt.u32.totalorder %s137_s30, %s159_s25 }
  0x3c   : > { %p167_p9 = scmp.lt.u32.totalorder %s159_s25, %s55_s22 }
  0x3d   : > { %p161_p4 = pnand %p160_p3, %p113_p2  ;;  %p166_p8 = por %p165_p7, %p164_p6 }
  0x3f   : > { %p162_p5 = pneg %p161_p4  ;;  %p168_p10 = por %p167_p9, %p166_p8 }
  0x41   : > { %p169_p11 = pnand %p168_p10, %p162_p5 }
  0x43   : > { %172 = shalt.err (!%p169_p11)  }
  0x44   : > { %s173_s29 = scalar_lea.vmem %s66_s18, 16  ;;  %p180_p3 = scmp.lt.s32.totalorder %s66_s18, %s232_s23 }
  0x45   : > { %p174_p12 = scmp.ne.s32.totalorder %s66_s18, %s173_s29  ;;  %p181_p4 = scmp.lt.s32.totalorder %s151_s8, %s173_s29 }
  0x47   : > { %p175_p13 = pnand %p174_p12, %p113_p2  ;;  %p182_p1 = por %p181_p4, %p180_p3 }
  0x49   : > { %p176_p0 = pneg %p175_p13 }
  0x4b   : > { %p183_p6 = pnand %p182_p1, %p176_p0 }
  0x4d   : > { %186 = shalt.err (!%p183_p6)  }
  0x4e   : > { %112 = dma.hbm_to_vmem [thread:$0]  (%p113_p2), %s55_s22, 16, %s66_s18, %s57_s24  ;;  %v69_v1 = vld [vmem:[%s306_s2] sm:$0x1] }
  0x4f   : > { %v70_v2 = vld [vmem:[%s42_s11] sm:$0x1]  ;;  %s307_s7 = smov %s262_s9 }
  0x50   : > { %v71_v3 = vadd.f32 %v70_v2, %v69_v1  ;;  %p308_p1 = scmp.ge.s32.totalorder %s307_s7, 16 }
  0x52   : > { %72 = vst [vmem:[%s306_s2] sm:$0x1] %v71_v3  ;;  %39 = sbr.rel (!%p308_p1) target bundleno = 41 (0x29), region = 54 }
  0x59   :  { %77 = vsyncpa [#allocation5], 1 }
  0x5a   :  { %78 = vsyncmov [#allocation3] }
  0x5d   :  { %s79_s12 = vpop.sfrf %78 }
  0x5e   :  { %p107_p2 = scmp.ne.s32.totalorder %s79_s12, 0 }
  0x60   :  { %83 = shalt.err (%p107_p2)  }
  0x61   :  { %85 = vsyncmov [#allocation3 + $0x1] }
  0x64   :  { %s86_s13 = vpop.sfrf %85 }
  0x65   :  { %p108_p5 = scmp.ne.s32.totalorder %s86_s13, 0 }
  0x67   :  { %90 = shalt.err (%p108_p5)  }

</bundles_post_ra>
